<compile_context>
chip_gen: v6e
topology: v6e:2x2x1
jax: 0.10.0
libtpu: 0.0.40
codegen_flags: <defaults>
</compile_context>

<pallas_src>
import functools

import jax
import jax.numpy as jnp
from jax import lax
from jax.experimental import pallas as pl
from jax.experimental.pallas import tpu as pltpu


def _round_up(x, m):
    return ((x + m - 1) // m) * m


def _focal_loss_kernel(x_ref, tgt_ref, w_ref, out_ref, *,
                       gamma, n_rows, tile_n, tiles_per_core, any_ragged):
    c = pl.program_id(0)          # partial-sum / TensorCore index ("parallel")
    i = pl.program_id(1)          # reduction step within this core ("arbitrary")

    # Output block (c, 0, 0) is resident across the whole inner axis -> use it
    # directly as the accumulator: lane 0 = numerator, lane 1 = denominator.
    @pl.when(i == 0)
    def _():
        out_ref[...] = jnp.zeros_like(out_ref)

    tile_idx = c * tiles_per_core + i            # intended (unclamped) row tile
    tile_start = tile_idx * tile_n
    lane = lax.broadcasted_iota(jnp.int32, out_ref.shape, 2)

    def accumulate(masked):
        x = x_ref[...].astype(jnp.float32)       # (tile, C) logits
        t = tgt_ref[...]                         # (tile, 1) int32 targets
        w = w_ref[...]                           # (1, C)    f32 class weights
        tile, C = x.shape

        if masked:
            # Ragged last tile / duplicated (clamped) tile: rows whose global
            # index >= n_rows contribute nothing; zero their logits so padding
            # garbage (possibly NaN/inf) cannot poison the reductions.
            row = tile_start + lax.broadcasted_iota(jnp.int32, (tile, 1), 0)
            row_ok = row < n_rows
            x = jnp.where(row_ok, x, 0.0)

        # Numerically stable log-sum-exp over classes (only full-tile work).
        m = jnp.max(x, axis=-1, keepdims=True)
        lse = jnp.log(jnp.sum(jnp.exp(x - m), axis=-1, keepdims=True)) + m

        # In-kernel target-column selection: no (N,C) one-hot in HBM and no f32
        # one-hot in VMEM -- a bool compare + select + lane reduction.
        cls = lax.broadcasted_iota(jnp.int32, (tile, C), 1)
        hit = cls == t
        x_t = jnp.sum(jnp.where(hit, x, 0.0), axis=-1, keepdims=True)   # (tile,1)
        w_t = jnp.sum(jnp.where(hit, w, 0.0), axis=-1, keepdims=True)   # (tile,1)
        if masked:
            w_t = jnp.where(row_ok, w_t, 0.0)

        # Focal term only on the gathered target column ((tile,1) vectors).
        logpt_t = x_t - lse
        pt_t = jnp.exp(logpt_t)
        # clamp avoids pow(negative, float) NaN if pt rounds slightly above 1
        # (intentional, harmless divergence from the reference in that corner)
        om = jnp.maximum(1.0 - pt_t, 0.0)

        g = float(gamma)
        if g == 0.0:
            foc = jnp.ones_like(om)
        elif g.is_integer() and 1.0 <= g <= 8.0:
            foc = om                              # integer gamma: VPU multiplies,
            for _ in range(int(g) - 1):           # no transcendental pow
                foc = foc * om
        else:
            foc = om ** g

        num = jnp.sum(w_t * foc * logpt_t)        # per-tile scalar partials
        den = jnp.sum(w_t)
        out_ref[...] += jnp.where(lane == 0, num,
                                  jnp.where(lane == 1, den, 0.0))

    if any_ragged:
        # Only the (at most two) ragged/duplicated tiles take the masked path;
        # steady-state tiles skip the full-(tile,C) select entirely.
        is_full = (tile_start + tile_n) <= n_rows
        pl.when(is_full)(lambda: accumulate(False))
        pl.when(jnp.logical_not(is_full))(lambda: accumulate(True))
    else:
        accumulate(False)


def focal_classification_loss(inputs, targets, weight, gamma, *,
                              max_tile_rows=None):
    """inputs: (N, C) float (any dtype), targets: (N,) int, weight: (C,) float."""
    N, C = inputs.shape
    in_bytes = inputs.dtype.itemsize

    x = inputs                                    # native dtype; cast in-kernel
    t = targets.astype(jnp.int32).reshape(N, 1)
    w = weight.astype(jnp.float32).reshape(1, C)

    # --- generation-aware sizing ---------------------------------------------
    try:
        vmem_cap = int(getattr(pltpu.get_tpu_info(), "vmem_capacity_bytes", 0))
    except Exception:
        vmem_cap = 0
    if vmem_cap <= 0:
        vmem_cap = 64 << 20                       # conservative (v7x per-core)

    align = max(8, 32 // in_bytes)                # sublane packing (f32:8, bf16:16)

    # Per-row VMEM cost: double-buffered logits block + double-buffered
    # lane-padded (tile,1) targets block + ~4 live full-tile f32 temporaries.
    per_row_vmem = 2 * C * in_bytes + 2 * 128 * 4 + 4 * C * 4
    tile_budget = (vmem_cap * 3) // 5             # headroom for compiler temps
    by_vmem = max(align, ((tile_budget // per_row_vmem) // align) * align)

    # Bytes-per-step target (~4 MiB of logits) so the streaming reduction runs
    # near the HBM roofline instead of being per-step-overhead bound.
    target_bytes = 4 << 20
    by_stream = max(align, ((target_bytes // max(1, C * in_bytes)) // align) * align)

    tile_n = min(by_stream, by_vmem, _round_up(N, align))
    if max_tile_rows is not None:
        tile_n = min(tile_n, max(align, (int(max_tile_rows) // align) * align))

    num_tiles = pl.cdiv(N, tile_n)
    num_cores = 2                                 # per-core partials (megacore on v7x)
    tiles_per_core = pl.cdiv(num_tiles, num_cores)
    need_clamp = num_cores * tiles_per_core != num_tiles
    any_ragged = (N % tile_n != 0) or need_clamp

    def row_block_map(cidx, i):
        idx = cidx * tiles_per_core + i
        if need_clamp:
            # Keep the DMA in-bounds for the duplicated trailing tile; its rows
            # are masked out in-kernel via the global row index.
            idx = jnp.minimum(idx, num_tiles - 1)
        return (idx, 0)

    kernel = functools.partial(
        _focal_loss_kernel, gamma=float(gamma), n_rows=N, tile_n=tile_n,
        tiles_per_core=tiles_per_core, any_ragged=any_ragged)

    est = tile_n * per_row_vmem + 2 * C * 4 + num_cores * 128 * 4
    vmem_limit = int(min(vmem_cap * 3 // 4, max(2 * est + (8 << 20), 32 << 20)))

    cost = pl.CostEstimate(
        flops=int(6 * N * C),
        transcendentals=int(N * C),
        bytes_accessed=int(N * C * in_bytes + N * 4 + C * 4 + num_cores * 128 * 4),
    )

    out = pl.pallas_call(
        kernel,
        out_shape=jax.ShapeDtypeStruct((num_cores, 1, 128), jnp.float32),
        grid_spec=pltpu.PrefetchScalarGridSpec(
            num_scalar_prefetch=0,
            grid=(num_cores, tiles_per_core),
            in_specs=[
                pl.BlockSpec((tile_n, C), row_block_map),    # logits (native dtype)
                pl.BlockSpec((tile_n, 1), row_block_map),    # int32 targets
                pl.BlockSpec((1, C), lambda c, i: (0, 0)),   # class weights (resident)
            ],
            out_specs=pl.BlockSpec((1, 1, 128), lambda c, i: (c, 0, 0)),
        ),
        compiler_params=pltpu.CompilerParams(
            dimension_semantics=("parallel", "arbitrary"),
            vmem_limit_bytes=vmem_limit,
        ),
        cost_estimate=cost,
    )(x, t, w)

    # Per-core partials: lane 0 = sum_i w_i*(1-pt_i)^g*logpt_i, lane 1 = sum_i w_i.
    num = jnp.sum(out[:, 0, 0])
    den = jnp.sum(out[:, 0, 1])
    # F.nll_loss with weight: -(num / den); no zero-guard, matching PyTorch.
    return -(num / den)


def _reference(inputs, targets, weight, gamma):
    logpt = jax.nn.log_softmax(inputs.astype(jnp.float32), axis=1)
    pt = jnp.exp(logpt)
    logpt = (1.0 - pt) ** gamma * logpt
    picked = jnp.take_along_axis(logpt, targets[:, None], axis=1)[:, 0]
    w_i = weight[targets]
    return -jnp.sum(w_i * picked) / jnp.sum(w_i)


if __name__ == "__main__":
    key = jax.random.PRNGKey(0)
    gamma = 2.0

    # Case 1: small batch (matches the module spec scale): 8 samples, 10 classes.
    N, C = 8, 10
    k1, k2 = jax.random.split(key)
    inputs = jax.random.normal(k1, (N, C), dtype=jnp.float32)
    targets = jax.random.randint(k2, (N,), 0, C, dtype=jnp.int32)
    weight = jnp.linspace(0.5, 1.5, C, dtype=jnp.float32)   # args.weight

    loss = jax.block_until_ready(focal_classification_loss(inputs, targets, weight, gamma))
    ref = _reference(inputs, targets, weight, gamma)
    assert jnp.allclose(loss, ref, atol=1e-5, rtol=1e-5), (loss, ref)

    # Case 2: ragged multi-tile reduction (exercises masked path + both partials).
    N2, C2 = 200, 10
    k3, k4 = jax.random.split(k1)
    inputs2 = jax.random.normal(k3, (N2, C2), dtype=jnp.float32)
    targets2 = jax.random.randint(k4, (N2,), 0, C2, dtype=jnp.int32)
    weight2 = jnp.linspace(0.5, 1.5, C2, dtype=jnp.float32)

    loss2 = jax.block_until_ready(
        focal_classification_loss(inputs2, targets2, weight2, gamma, max_tile_rows=64))
    ref2 = _reference(inputs2, targets2, weight2, gamma)
    assert jnp.allclose(loss2, ref2, atol=1e-5, rtol=1e-5), (loss2, ref2)

    print("KERNEL_OK")
</pallas_src>

<mosaic_0001>
module attributes {stable_mosaic.version = 11 : i64} {
  func.func @_focal_loss_kernel(%arg0: i32, %arg1: i32, %arg2: memref<8x10xf32, #tpu.memory_space<vmem>>, %arg3: memref<8x1xi32, #tpu.memory_space<vmem>>, %arg4: memref<1x10xf32, #tpu.memory_space<vmem>>, %arg5: memref<1x1x128xf32, #tpu.memory_space<vmem>>) attributes {dimension_semantics = [#tpu.dimension_semantics<parallel>, #tpu.dimension_semantics<arbitrary>], iteration_bounds = array<i64: 2, 1>, scalar_prefetch = 0 : i64, scratch_operands = 0 : i64, tpu.core_type = #tpu.core_type<tc>, window_params = [{transform_indices = @transform_0, window_bounds = array<i64: 8, 10>}, {transform_indices = @transform_1, window_bounds = array<i64: 8, 1>}, {pipeline_mode = #tpu.pipeline_mode<synchronous>, transform_indices = @transform_2, window_bounds = array<i64: 1, 10>}, {transform_indices = @transform_3, window_bounds = array<i64: 1, 1, 128>}]} {
    %c0_i32 = arith.constant 0 : i32
    %0 = arith.cmpi eq, %arg1, %c0_i32 : i32
    %1 = arith.extui %0 : i1 to i32
    %c0_i32_0 = arith.constant 0 : i32
    %2 = arith.cmpi ne, %1, %c0_i32_0 : i32
    scf.if %2 {
      %cst = arith.constant 0.000000e+00 : f32
      %14 = vector.broadcast %cst : f32 to vector<1x1x128xf32>
      %c0 = arith.constant 0 : index
      %c0_5 = arith.constant 0 : index
      %c0_6 = arith.constant 0 : index
      %15 = vector.load %arg5[%c0, %c0_5, %c0_6] : memref<1x1x128xf32, #tpu.memory_space<vmem>>, vector<1x1x128xf32>
      tpu.vector_store %arg5[%c0, %c0_5, %c0_6], %14 {strides = array<i32>} : memref<1x1x128xf32, #tpu.memory_space<vmem>>, vector<1x1x128xf32>,
    } else {
    }
    %c1_i32 = arith.constant 1 : i32
    %3 = arith.muli %arg0, %c1_i32 : i32
    %4 = arith.addi %3, %arg1 : i32
    %c8_i32 = arith.constant 8 : i32
    %5 = arith.muli %4, %c8_i32 : i32
    %6 = tpu.iota {dimensions = array<i32: 2>} : vector<1x1x128xi32>
    %c8_i32_1 = arith.constant 8 : i32
    %7 = arith.addi %5, %c8_i32_1 : i32
    %c8_i32_2 = arith.constant 8 : i32
    %8 = arith.cmpi sle, %7, %c8_i32_2 : i32
    %9 = arith.extui %8 : i1 to i32
    %c0_i32_3 = arith.constant 0 : i32
    %10 = arith.cmpi ne, %9, %c0_i32_3 : i32
    scf.if %10 {
      %c0 = arith.constant 0 : index
      %c0_5 = arith.constant 0 : index
      %14 = vector.load %arg2[%c0, %c0_5] : memref<8x10xf32, #tpu.memory_space<vmem>>, vector<8x10xf32>
      %c0_6 = arith.constant 0 : index
      %c0_7 = arith.constant 0 : index
      %15 = vector.load %arg3[%c0_6, %c0_7] : memref<8x1xi32, #tpu.memory_space<vmem>>, vector<8x1xi32>
      %c0_8 = arith.constant 0 : index
      %c0_9 = arith.constant 0 : index
      %16 = vector.load %arg4[%c0_8, %c0_9] : memref<1x10xf32, #tpu.memory_space<vmem>>, vector<1x10xf32>
      %cst = arith.constant dense<0xFF800000> : vector<8xf32>
      %17 = vector.multi_reduction <maximumf>, %14, %cst [1] : vector<8x10xf32> to vector<8xf32>
      %18 = vector.shape_cast %17 : vector<8xf32> to vector<8x1xf32>
      %19 = vector.broadcast %18 : vector<8x1xf32> to vector<8x10xf32>
      %20 = arith.subf %14, %19 : vector<8x10xf32>
      %21 = math.exp %20 : vector<8x10xf32>
      %cst_10 = arith.constant dense<0.000000e+00> : vector<8xf32>
      %22 = vector.multi_reduction <add>, %21, %cst_10 [1] : vector<8x10xf32> to vector<8xf32>
      %23 = vector.shape_cast %22 : vector<8xf32> to vector<8x1xf32>
      %24 = math.log %23 : vector<8x1xf32>
      %25 = arith.addf %24, %18 : vector<8x1xf32>
      %26 = tpu.iota {dimensions = array<i32: 1>} : vector<8x10xi32>
      %27 = vector.broadcast %15 : vector<8x1xi32> to vector<8x10xi32>
      %28 = arith.cmpi eq, %26, %27 : vector<8x10xi32>
      %cst_11 = arith.constant 0.000000e+00 : f32
      %29 = vector.broadcast %cst_11 : f32 to vector<8x10xf32>
      %30 = arith.select %28, %14, %29 : vector<8x10xi1>, vector<8x10xf32>
      %cst_12 = arith.constant dense<0.000000e+00> : vector<8xf32>
      %31 = vector.multi_reduction <add>, %30, %cst_12 [1] : vector<8x10xf32> to vector<8xf32>
      %32 = vector.shape_cast %31 : vector<8xf32> to vector<8x1xf32>
      %cst_13 = arith.constant 0.000000e+00 : f32
      %33 = vector.shape_cast %16 : vector<1x10xf32> to vector<1x10xf32>
      %34 = vector.broadcast %33 : vector<1x10xf32> to vector<8x10xf32>
      %35 = vector.broadcast %cst_13 : f32 to vector<8x10xf32>
      %36 = arith.select %28, %34, %35 : vector<8x10xi1>, vector<8x10xf32>
      %cst_14 = arith.constant dense<0.000000e+00> : vector<8xf32>
      %37 = vector.multi_reduction <add>, %36, %cst_14 [1] : vector<8x10xf32> to vector<8xf32>
      %38 = vector.shape_cast %37 : vector<8xf32> to vector<8x1xf32>
      %39 = arith.subf %32, %25 : vector<8x1xf32>
      %40 = math.exp %39 : vector<8x1xf32>
      %cst_15 = arith.constant 1.000000e+00 : f32
      %41 = vector.broadcast %cst_15 : f32 to vector<8x1xf32>
      %42 = arith.subf %41, %40 : vector<8x1xf32>
      %cst_16 = arith.constant 0.000000e+00 : f32
      %43 = vector.broadcast %cst_16 : f32 to vector<8x1xf32>
      %44 = arith.maximumf %42, %43 : vector<8x1xf32>
      %45 = arith.mulf %44, %44 : vector<8x1xf32>
      %46 = arith.mulf %38, %45 : vector<8x1xf32>
      %47 = arith.mulf %46, %39 : vector<8x1xf32>
      %48 = vector.shape_cast %47 : vector<8x1xf32> to vector<1x8x1xf32>
      %cst_17 = arith.constant dense<0.000000e+00> : vector<1xf32>
      %49 = vector.multi_reduction <add>, %48, %cst_17 [1, 2] : vector<1x8x1xf32> to vector<1xf32>
      %50 = vector.shape_cast %49 : vector<1xf32> to vector<1x1x1xf32>
      %51 = vector.extract %50[0, 0, 0] : f32 from vector<1x1x1xf32>
      %52 = vector.shape_cast %38 : vector<8x1xf32> to vector<1x8x1xf32>
      %cst_18 = arith.constant dense<0.000000e+00> : vector<1xf32>
      %53 = vector.multi_reduction <add>, %52, %cst_18 [1, 2] : vector<1x8x1xf32> to vector<1xf32>
      %54 = vector.shape_cast %53 : vector<1xf32> to vector<1x1x1xf32>
      %55 = vector.extract %54[0, 0, 0] : f32 from vector<1x1x1xf32>
      %c0_19 = arith.constant 0 : index
      %c0_20 = arith.constant 0 : index
      %c0_21 = arith.constant 0 : index
      %56 = vector.load %arg5[%c0_19, %c0_20, %c0_21] : memref<1x1x128xf32, #tpu.memory_space<vmem>>, vector<1x1x128xf32>
      %c0_i32_22 = arith.constant 0 : i32
      %57 = vector.broadcast %c0_i32_22 : i32 to vector<1x1x128xi32>
      %58 = arith.cmpi eq, %6, %57 : vector<1x1x128xi32>
      %c1_i32_23 = arith.constant 1 : i32
      %59 = vector.broadcast %c1_i32_23 : i32 to vector<1x1x128xi32>
      %60 = arith.cmpi eq, %6, %59 : vector<1x1x128xi32>
      %cst_24 = arith.constant 0.000000e+00 : f32
      %61 = vector.broadcast %55 : f32 to vector<1x1x128xf32>
      %62 = vector.broadcast %cst_24 : f32 to vector<1x1x128xf32>
      %63 = arith.select %60, %61, %62 : vector<1x1x128xi1>, vector<1x1x128xf32>
      %64 = vector.broadcast %51 : f32 to vector<1x1x128xf32>
      %65 = arith.select %58, %64, %63 : vector<1x1x128xi1>, vector<1x1x128xf32>
      %66 = arith.addf %56, %65 : vector<1x1x128xf32>
      %c0_25 = arith.constant 0 : index
      %c0_26 = arith.constant 0 : index
      %c0_27 = arith.constant 0 : index
      %67 = vector.load %arg5[%c0_25, %c0_26, %c0_27] : memref<1x1x128xf32, #tpu.memory_space<vmem>>, vector<1x1x128xf32>
      tpu.vector_store %arg5[%c0_25, %c0_26, %c0_27], %66 {strides = array<i32>} : memref<1x1x128xf32, #tpu.memory_space<vmem>>, vector<1x1x128xf32>,
    } else {
    }
    %true = arith.constant true
    %11 = arith.xori %8, %true : i1
    %12 = arith.extui %11 : i1 to i32
    %c0_i32_4 = arith.constant 0 : i32
    %13 = arith.cmpi ne, %12, %c0_i32_4 : i32
    scf.if %13 {
      %c0 = arith.constant 0 : index
      %c0_5 = arith.constant 0 : index
      %14 = vector.load %arg2[%c0, %c0_5] : memref<8x10xf32, #tpu.memory_space<vmem>>, vector<8x10xf32>
      %c0_6 = arith.constant 0 : index
      %c0_7 = arith.constant 0 : index
      %15 = vector.load %arg3[%c0_6, %c0_7] : memref<8x1xi32, #tpu.memory_space<vmem>>, vector<8x1xi32>
      %c0_8 = arith.constant 0 : index
      %c0_9 = arith.constant 0 : index
      %16 = vector.load %arg4[%c0_8, %c0_9] : memref<1x10xf32, #tpu.memory_space<vmem>>, vector<1x10xf32>
      %17 = tpu.iota {dimensions = array<i32: 0>} : vector<8x1xi32>
      %18 = vector.broadcast %5 : i32 to vector<8x1xi32>
      %19 = arith.addi %18, %17 : vector<8x1xi32>
      %c8_i32_10 = arith.constant 8 : i32
      %20 = vector.broadcast %c8_i32_10 : i32 to vector<8x1xi32>
      %21 = arith.cmpi slt, %19, %20 : vector<8x1xi32>
      %cst = arith.constant 0.000000e+00 : f32
      %22 = vector.shape_cast %21 : vector<8x1xi1> to vector<8x1xi1>
      %23 = vector.broadcast %22 : vector<8x1xi1> to vector<8x10xi1>
      %24 = vector.broadcast %cst : f32 to vector<8x10xf32>
      %25 = arith.select %23, %14, %24 : vector<8x10xi1>, vector<8x10xf32>
      %cst_11 = arith.constant dense<0xFF800000> : vector<8xf32>
      %26 = vector.multi_reduction <maximumf>, %25, %cst_11 [1] : vector<8x10xf32> to vector<8xf32>
      %27 = vector.shape_cast %26 : vector<8xf32> to vector<8x1xf32>
      %28 = vector.broadcast %27 : vector<8x1xf32> to vector<8x10xf32>
      %29 = arith.subf %25, %28 : vector<8x10xf32>
      %30 = math.exp %29 : vector<8x10xf32>
      %cst_12 = arith.constant dense<0.000000e+00> : vector<8xf32>
      %31 = vector.multi_reduction <add>, %30, %cst_12 [1] : vector<8x10xf32> to vector<8xf32>
      %32 = vector.shape_cast %31 : vector<8xf32> to vector<8x1xf32>
      %33 = math.log %32 : vector<8x1xf32>
      %34 = arith.addf %33, %27 : vector<8x1xf32>
      %35 = tpu.iota {dimensions = array<i32: 1>} : vector<8x10xi32>
      %36 = vector.broadcast %15 : vector<8x1xi32> to vector<8x10xi32>
      %37 = arith.cmpi eq, %35, %36 : vector<8x10xi32>
      %cst_13 = arith.constant 0.000000e+00 : f32
      %38 = vector.broadcast %cst_13 : f32 to vector<8x10xf32>
      %39 = arith.select %37, %25, %38 : vector<8x10xi1>, vector<8x10xf32>
      %cst_14 = arith.constant dense<0.000000e+00> : vector<8xf32>
      %40 = vector.multi_reduction <add>, %39, %cst_14 [1] : vector<8x10xf32> to vector<8xf32>
      %41 = vector.shape_cast %40 : vector<8xf32> to vector<8x1xf32>
      %cst_15 = arith.constant 0.000000e+00 : f32
      %42 = vector.shape_cast %16 : vector<1x10xf32> to vector<1x10xf32>
      %43 = vector.broadcast %42 : vector<1x10xf32> to vector<8x10xf32>
      %44 = vector.broadcast %cst_15 : f32 to vector<8x10xf32>
      %45 = arith.select %37, %43, %44 : vector<8x10xi1>, vector<8x10xf32>
      %cst_16 = arith.constant dense<0.000000e+00> : vector<8xf32>
      %46 = vector.multi_reduction <add>, %45, %cst_16 [1] : vector<8x10xf32> to vector<8xf32>
      %47 = vector.shape_cast %46 : vector<8xf32> to vector<8x1xf32>
      %cst_17 = arith.constant 0.000000e+00 : f32
      %48 = vector.broadcast %cst_17 : f32 to vector<8x1xf32>
      %49 = arith.select %21, %47, %48 : vector<8x1xi1>, vector<8x1xf32>
      %50 = arith.subf %41, %34 : vector<8x1xf32>
      %51 = math.exp %50 : vector<8x1xf32>
      %cst_18 = arith.constant 1.000000e+00 : f32
      %52 = vector.broadcast %cst_18 : f32 to vector<8x1xf32>
      %53 = arith.subf %52, %51 : vector<8x1xf32>
      %cst_19 = arith.constant 0.000000e+00 : f32
      %54 = vector.broadcast %cst_19 : f32 to vector<8x1xf32>
      %55 = arith.maximumf %53, %54 : vector<8x1xf32>
      %56 = arith.mulf %55, %55 : vector<8x1xf32>
      %57 = arith.mulf %49, %56 : vector<8x1xf32>
      %58 = arith.mulf %57, %50 : vector<8x1xf32>
      %59 = vector.shape_cast %58 : vector<8x1xf32> to vector<1x8x1xf32>
      %cst_20 = arith.constant dense<0.000000e+00> : vector<1xf32>
      %60 = vector.multi_reduction <add>, %59, %cst_20 [1, 2] : vector<1x8x1xf32> to vector<1xf32>
      %61 = vector.shape_cast %60 : vector<1xf32> to vector<1x1x1xf32>
      %62 = vector.extract %61[0, 0, 0] : f32 from vector<1x1x1xf32>
      %63 = vector.shape_cast %49 : vector<8x1xf32> to vector<1x8x1xf32>
      %cst_21 = arith.constant dense<0.000000e+00> : vector<1xf32>
      %64 = vector.multi_reduction <add>, %63, %cst_21 [1, 2] : vector<1x8x1xf32> to vector<1xf32>
      %65 = vector.shape_cast %64 : vector<1xf32> to vector<1x1x1xf32>
      %66 = vector.extract %65[0, 0, 0] : f32 from vector<1x1x1xf32>
      %c0_22 = arith.constant 0 : index
      %c0_23 = arith.constant 0 : index
      %c0_24 = arith.constant 0 : index
      %67 = vector.load %arg5[%c0_22, %c0_23, %c0_24] : memref<1x1x128xf32, #tpu.memory_space<vmem>>, vector<1x1x128xf32>
      %c0_i32_25 = arith.constant 0 : i32
      %68 = vector.broadcast %c0_i32_25 : i32 to vector<1x1x128xi32>
      %69 = arith.cmpi eq, %6, %68 : vector<1x1x128xi32>
      %c1_i32_26 = arith.constant 1 : i32
      %70 = vector.broadcast %c1_i32_26 : i32 to vector<1x1x128xi32>
      %71 = arith.cmpi eq, %6, %70 : vector<1x1x128xi32>
      %cst_27 = arith.constant 0.000000e+00 : f32
      %72 = vector.broadcast %66 : f32 to vector<1x1x128xf32>
      %73 = vector.broadcast %cst_27 : f32 to vector<1x1x128xf32>
      %74 = arith.select %71, %72, %73 : vector<1x1x128xi1>, vector<1x1x128xf32>
      %75 = vector.broadcast %62 : f32 to vector<1x1x128xf32>
      %76 = arith.select %69, %75, %74 : vector<1x1x128xi1>, vector<1x1x128xf32>
      %77 = arith.addf %67, %76 : vector<1x1x128xf32>
      %c0_28 = arith.constant 0 : index
      %c0_29 = arith.constant 0 : index
      %c0_30 = arith.constant 0 : index
      %78 = vector.load %arg5[%c0_28, %c0_29, %c0_30] : memref<1x1x128xf32, #tpu.memory_space<vmem>>, vector<1x1x128xf32>
      tpu.vector_store %arg5[%c0_28, %c0_29, %c0_30], %77 {strides = array<i32>} : memref<1x1x128xf32, #tpu.memory_space<vmem>>, vector<1x1x128xf32>,
    } else {
    }
    return
  }
  func.func @transform_0(%arg0: i32, %arg1: i32) -> (i32, i32) {
    %c1_i32 = arith.constant 1 : i32
    %0 = arith.muli %arg0, %c1_i32 : i32
    %1 = arith.addi %0, %arg1 : i32
    %c0_i32 = arith.constant 0 : i32
    %2 = arith.minsi %1, %c0_i32 : i32
    %c0_i32_0 = arith.constant 0 : i32
    %c0_i32_1 = arith.constant 0 : i32
    return %2, %c0_i32_0 : i32, i32
  }
  func.func @transform_1(%arg0: i32, %arg1: i32) -> (i32, i32) {
    %c1_i32 = arith.constant 1 : i32
    %0 = arith.muli %arg0, %c1_i32 : i32
    %1 = arith.addi %0, %arg1 : i32
    %c0_i32 = arith.constant 0 : i32
    %2 = arith.minsi %1, %c0_i32 : i32
    %c0_i32_0 = arith.constant 0 : i32
    %c0_i32_1 = arith.constant 0 : i32
    return %2, %c0_i32_0 : i32, i32
  }
  func.func @transform_2(%arg0: i32, %arg1: i32) -> (i32, i32) {
    %c0_i32 = arith.constant 0 : i32
    %c0_i32_0 = arith.constant 0 : i32
    %c0_i32_1 = arith.constant 0 : i32
    return %c0_i32, %c0_i32_0 : i32, i32
  }
  func.func @transform_3(%arg0: i32, %arg1: i32) -> (i32, i32, i32) {
    %c0_i32 = arith.constant 0 : i32
    %c0_i32_0 = arith.constant 0 : i32
    %c0_i32_1 = arith.constant 0 : i32
    return %arg0, %c0_i32, %c0_i32_0 : i32, i32, i32
  }
}

</mosaic_0001>

<bundles_post_ra>
// kernel: tpu_custom_call.1
= control target key start
LH: loop header
LB: loop body
LE: loop exit
PB: predicated region body
PF: predicated region fallthrough
CT: control target
= control target key end

     0   :  { %8 = vsyncpa [#allocation3], 0  ;;  %s855_s0 = inlined_call_operand.vmem [shape: f32[8,10], index: 0, kind: input, shape index: {}]   ;;  %s856_s1 = inlined_call_operand.vmem [shape: s32[8,1], index: 1, kind: input, shape index: {}]   ;;  %s857_s2 = inlined_call_operand.vmem [shape: f32[1,10], index: 2, kind: input, shape index: {}]   ;;  %s858_s3 = inlined_call_operand.hbm [shape: f32[2,1,128], index: 3, kind: output, shape index: {}]  }
   0x1   :  { %10 = vsyncpa [#allocation3 + $0x1], 0  ;;  %s698_s12 = smov 0   ;;  %s700_s13 = smov 0  }
   0x2   :  { %s702_s14 = smov 0   ;;  %s704_s15 = smov 0  }
   0x3   :  { %s706_s16 = smov 0   ;;  %s708_s17 = smov 0  }
   0x4 LB: > { %s495_s18 = sadd.s32 4294967295, %s672_s17   ;;  %s496_s19 = sadd.s32 4294967294, %s672_s17   ;;  %s672_s17 = sphi %s708_s17, %s16_s17   ;;  %s668_s16 = sphi %s706_s16, %s865_s16   ;;  %s664_s15 = sphi %s704_s15, %s864_s15   ;;  %s660_s14 = sphi %s702_s14, %s863_s14   ;;  %s656_s13 = sphi %s700_s13, %s862_s13   ;;  %s652_s12 = sphi %s698_s12, %s861_s12  }
   0x5   : > { %s28_s20 = sadd.s32 1, %s668_s16  ;;  %s120_s21 = sadd.s32 1, %s660_s14 }
   0x6   : > { %p30_p0 = scmp.ge.s32.totalorder %s28_s20, 2  ;;  %p130_p1 = scmp.ne.s32.totalorder %s660_s14, %s656_s13 }
   0x7   : > { %p131_p2 = scmp.eq.s32.totalorder %s495_s18, 1  ;;  %p136_p3 = scmp.ne.s32.totalorder %s656_s13, %s652_s12 }
   0x8   : > { %s867_s20 = smov (%p30_p0, %s28_s20), 0  ;;  %p137_p5 = scmp.eq.s32.totalorder %s496_s19, 1 }
   0x9   : > { %p738_p4 = por %p131_p2, %p130_p1  ;;  %s117_s23 = ssub.s32 %s668_s16, %s867_s20 }
   0xa   : > { %p499_p6 = scmp.ge.s32.totalorder %s672_s17, 1  ;;  %p118_p7 = scmp.eq.s32.totalorder %s117_s23, 0 }
   0xb   : > { %p745_p8 = por %p137_p5, %p136_p3  ;;  %p184_p9 = scmp.lt.s32.totalorder %s672_s17, 3 }
   0xc   : > { %s751_s25 = scalar_select %p118_p7, %s660_s14, %s120_s21  }
   0xd   : > { %p185_p10 = pnand %p499_p6, %p184_p9 }
   0xe   : > { %s214_s26 = sand.u32 (!%p185_p10), 1, %s656_s13   ;;  %p217_p11 = scmp.lt.s32.totalorder (!%p185_p10), %s664_s15, 0 }
   0xf   : > { %188 = sbr.rel (%p185_p10) target bundleno = 1169 (0x491), region = 32  ;;  %s508_s27 = sshll.u32 (!%p185_p10), %s664_s15, 3 }
  0x10   : > { %s759_s29 = scalar_lea.vmem (!%p185_p10), [#allocation2], %s214_s26  ;;  %s767_s30 = sadd.s32 (!%p185_p10), 8, %s508_s27 }
  0x11   : > { %p509_p12 = scmp.gt.s32.totalorder (!%p185_p10), %s767_s30, 8 }
  0x14   : > { %v243_v0 = vlaneseq  ;;  %s218_s28 = scalar_select %p217_p11, %s664_s15, 0  ;;  %v674_v1 = vmov 0.0  }
  0x15   : > { %240 = vst [vmem:[%s759_s29] sm:$0x1] %v674_v1  ;;  %249 = sbr.rel (%p509_p12) target bundleno = 580 (0x244), region = 40 }
  0x16   : > { %v763_v2 = vand.u32 127, %v243_v0  ;;  %s869_s28 = smov (!%p217_p11, %s218_s28), 0 }
  0x17   : > { %s503_s4 = sshll.u32 %s869_s28, 3 }
  0x18   : > { %s772_s7 = scalar_lea.vmem %s855_s0, %s503_s4  ;;  %s777_s10 = scalar_lea.vmem %s856_s1, %s503_s4 }
  0x1a   : > { %v250_v3 = vld [vmem:[%s772_s7] sm:$0xff]  ;;  %vm253_vm0 = vcmask 80896   ;;  %v675_v5 = vmov 0   ;;  %vm292_vm2 = vcmask 7168   ;;  %vm315_vm3 = vcmp.eq.s32.totalorder %v763_v2, 1 }
  0x1b   : > { %v254_v4 = vsel %vm253_vm0, %v250_v3, -inf  ;;  %582 = vset.pattern.permute.xlu0 %v675_v5  ;;  %v251_v6 = vld [vmem:[%s777_s10] sm:$0xff]  ;;  %vm314_vm4 = vcmp.eq.s32.totalorder %v763_v2, 0 }
  0x1c   : > { %255 = vmax.xlane.f32.xlu0 %v254_v4  ;;  %v510_v14 = vld [vmem:[%s857_s2] ss:$0 sm:$0xff] }
  0x1d   : > { %v313_v48 = vld [vmem:[%s759_s29] sm:$0x1] }
  0x32   : > { %267 = vperm.xlu0 %582, %v251_v6  }
  0xa5   : > { %v256_v7 = vpop.xlane.xlu0 %255 }
  0xa6   : > { %v257_v8 = vsub.f32 %v250_v3, %v256_v7 }
  0xa8   : > { %v258_v9 = vmul.f32 1.442695, %v257_v8 }
  0xaa   : > { %583 = vpow2.f32 %v258_v9 }
  0xad   : > { %v268_v10 = vpop.permute.xlu0 %267 }
  0xae   : > { %vm269_vm1 = vcmp.eq.s32.totalorder %v763_v2, %v268_v10 }
  0xaf   : > { %v270_v12 = vsel %vm269_vm1, %v250_v3, 0.0  ;;  %v280_v16 = vsel %vm269_vm1, %v510_v14, 0.0 }
  0xb0   : > { %v271_v15 = vsel %vm253_vm0, %v270_v12, 0.0  ;;  %v281_v17 = vsel %vm253_vm0, %v280_v16, 0.0 }
  0xb7   : > { %v584_v11 = vpop.eup %583 }
  0xb8   : > { %v260_v13 = vsel %vm253_vm0, %v584_v11, 0.0 }
  0xb9   : > { %261 = vadd.xlane.f32.xlu1 %v260_v13 }
  0xbd   : > { %272 = vadd.xlane.f32.xlu1 %v271_v15 }
  0xc1   : > { %282 = vadd.xlane.f32.xlu1 %v281_v17 }
 0x142   : > { %v262_v18 = vpop.xlane.xlu1 %261 }
 0x143   : > { %585 = vlog2.f32 %v262_v18 }
 0x146   : > { %v273_v22 = vpop.xlane.xlu1 %272 }
 0x14a   : > { %v283_v29 = vpop.xlane.xlu1 %282 }
 0x14b   : > { %v303_v33 = vsel %vm292_vm2, %v283_v29, 0.0 }
 0x150   : > { %v586_v19 = vpop.eup %585 }
 0x151   : > { %v264_v20 = vmul.f32 0.6931472, %v586_v19 }
 0x153   : > { %v265_v21 = vadd.f32 %v264_v20, %v256_v7 }
 0x155   : > { %v284_v23 = vsub.f32 %v273_v22, %v265_v21 }
 0x157   : > { %v285_v24 = vmul.f32 1.442695, %v284_v23 }
 0x159   : > { %587 = vpow2.f32 %v285_v24 }
 0x166   : > { %v588_v25 = vpop.eup %587 }
 0x167   : > { %v287_v26 = vsub.f32 1.0, %v588_v25 }
 0x169   : > { %v288_v27 = vmax.f32 %v287_v26, 0.0 }
 0x16b   : > { %v289_v28 = vmul.f32 %v288_v27, %v288_v27 }
 0x16d   : > { %v290_v30 = vmul.f32 %v289_v28, %v283_v29 }
 0x16f   : > { %v291_v31 = vmul.f32 %v290_v30, %v284_v23 }
 0x171   : > { %v293_v32 = vsel %vm292_vm2, %v291_v31, 0.0 }
 0x172   : > { %294 = vadd.xlane.f32.xlu1 %v293_v32 }
 0x176   : > { %304 = vadd.xlane.f32.xlu1 %v303_v33 }
 0x1fb   : > { %v295_v34 = vpop.xlane.xlu1 %294 }
 0x1fc   : > { %v296_v35 = vrot.slane %v295_v34, 4 }
 0x1fe   : > { %v297_v36 = vadd.f32 %v296_v35, %v295_v34 }
 0x1ff   : > { %v305_v37 = vpop.xlane.xlu1 %304 }
 0x200   : > { %v298_v38 = vrot.slane %v297_v36, 2  ;;  %v306_v39 = vrot.slane %v305_v37, 4 }
 0x202   : > { %v307_v40 = vadd.f32 %v306_v39, %v305_v37  ;;  %v299_v41 = vadd.f32 %v298_v38, %v297_v36 }
 0x204   : > { %v308_v42 = vrot.slane %v307_v40, 2  ;;  %v300_v43 = vrot.slane %v299_v41, 1 }
 0x206   : > { %v309_v44 = vadd.f32 %v308_v42, %v307_v40  ;;  %v301_v45 = vadd.f32 %v300_v43, %v299_v41 }
 0x208   : > { %516 = vpush %v301_v45  ;;  %v310_v46 = vrot.slane %v309_v44, 1 }
 0x20a   : > { %v311_v47 = vadd.f32 %v310_v46, %v309_v44 }
 0x20c   : > { %518 = vpush %v311_v47 }
 0x239   : > { %s517_s19 = spop %516 }
 0x23a   : > { %v318_v50 = vstv %s517_s19 }
 0x23d   : > { %s519_s21 = spop %518 }
 0x23e   : > { %v316_v49 = vstv %s519_s21 }
 0x23f   : > { %v317_v51 = vsel %vm315_vm3, %v316_v49, 0.0 }
 0x240   : > { %v319_v52 = vsel %vm314_vm4, %v318_v50, %v317_v51 }
 0x241   : > { %v320_v53 = vadd.f32 %v319_v52, %v313_v48 }
 0x243   : > { %321 = vst [vmem:[%s759_s29] sm:$0x1] %v320_v53 }
 0x244 PF: > { %p511_p13 = scmp.le.s32.totalorder %s767_s30, 8 }
 0x246   : > { %325 = sbr.rel (%p511_p13) target bundleno = 1146 (0x47a), region = 44 }
 0x24b   : > { %v330_v54 = vshrl.u32 %v243_v0, 7  ;;  %v331_v55 = vstv %s508_s27  ;;  %v676_v56 = vmov 0   ;;  %v326_v57 = vld [vmem:[%s772_s7] sm:$0xff]  ;;  %vm337_vm5 = vcmask 80896  }
 0x24c   : > { %589 = vset.pattern.permute.xlu0 %v676_v56  ;;  %v327_v61 = vld [vmem:[%s777_s10] sm:$0xff]  ;;  %vm377_vm8 = vcmask 7168   ;;  %vm400_vm9 = vcmp.eq.s32.totalorder %v763_v2, 1  ;;  %vm399_vm10 = vcmp.eq.s32.totalorder %v763_v2, 0 }
 0x24d   : > { %v332_v58 = vadd.s32 %v331_v55, %v330_v54  ;;  %v512_v6 = vld [vmem:[%s857_s2] ss:$0 sm:$0xff] }
 0x24e   : > { %v398_v41 = vld [vmem:[%s759_s29] sm:$0x1] }
 0x24f   : > { %vm333_vm6 = vcmp.lt.s32.totalorder %v332_v58, 8 }
 0x250   : > { %v336_v59 = vsel %vm333_vm6, %v326_v57, 0.0 }
 0x251   : > { %v338_v60 = vsel %vm337_vm5, %v336_v59, -inf }
 0x252   : > { %339 = vmax.xlane.f32.xlu0 %v338_v60 }
 0x268   : > { %351 = vperm.xlu0 %589, %v327_v61  }
 0x2db   : > { %v340_v62 = vpop.xlane.xlu0 %339 }
 0x2dc   : > { %v341_v63 = vsub.f32 %v336_v59, %v340_v62 }
 0x2de   : > { %v342_v1 = vmul.f32 1.442695, %v341_v63 }
 0x2e0   : > { %590 = vpow2.f32 %v342_v1 }
 0x2e3   : > { %v352_v0 = vpop.permute.xlu0 %351 }
 0x2e4   : > { %vm353_vm7 = vcmp.eq.s32.totalorder %v763_v2, %v352_v0 }
 0x2e5   : > { %v354_v4 = vsel %vm353_vm7, %v336_v59, 0.0  ;;  %v364_v8 = vsel %vm353_vm7, %v512_v6, 0.0 }
 0x2e6   : > { %v355_v7 = vsel %vm337_vm5, %v354_v4, 0.0  ;;  %v365_v9 = vsel %vm337_vm5, %v364_v8, 0.0 }
 0x2ed   : > { %v591_v3 = vpop.eup %590 }
 0x2ee   : > { %v344_v5 = vsel %vm337_vm5, %v591_v3, 0.0 }
 0x2ef   : > { %345 = vadd.xlane.f32.xlu1 %v344_v5 }
 0x2f3   : > { %356 = vadd.xlane.f32.xlu1 %v355_v7 }
 0x2f7   : > { %366 = vadd.xlane.f32.xlu1 %v365_v9 }
 0x378   : > { %v346_v10 = vpop.xlane.xlu1 %345 }
 0x379   : > { %592 = vlog2.f32 %v346_v10 }
 0x37c   : > { %v357_v14 = vpop.xlane.xlu1 %356 }
 0x380   : > { %v367_v20 = vpop.xlane.xlu1 %366 }
 0x381   : > { %v368_v22 = vsel %vm333_vm6, %v367_v20, 0.0 }
 0x382   : > { %v388_v26 = vsel %vm377_vm8, %v368_v22, 0.0 }
 0x386   : > { %v593_v11 = vpop.eup %592 }
 0x387   : > { %v348_v12 = vmul.f32 0.6931472, %v593_v11 }
 0x389   : > { %v349_v13 = vadd.f32 %v348_v12, %v340_v62 }
 0x38b   : > { %v369_v15 = vsub.f32 %v357_v14, %v349_v13 }
 0x38d   : > { %v370_v16 = vmul.f32 1.442695, %v369_v15 }
 0x38f   : > { %594 = vpow2.f32 %v370_v16 }
 0x39c   : > { %v595_v17 = vpop.eup %594 }
 0x39d   : > { %v372_v18 = vsub.f32 1.0, %v595_v17 }
 0x39f   : > { %v373_v19 = vmax.f32 %v372_v18, 0.0 }
 0x3a1   : > { %v374_v21 = vmul.f32 %v373_v19, %v373_v19 }
 0x3a3   : > { %v375_v23 = vmul.f32 %v374_v21, %v368_v22 }
 0x3a5   : > { %v376_v24 = vmul.f32 %v375_v23, %v369_v15 }
 0x3a7   : > { %v378_v25 = vsel %vm377_vm8, %v376_v24, 0.0 }
 0x3a8   : > { %379 = vadd.xlane.f32.xlu1 %v378_v25 }
 0x3ac   : > { %389 = vadd.xlane.f32.xlu1 %v388_v26 }
 0x431   : > { %v380_v27 = vpop.xlane.xlu1 %379 }
 0x432   : > { %v381_v28 = vrot.slane %v380_v27, 4 }
 0x434   : > { %v382_v29 = vadd.f32 %v381_v28, %v380_v27 }
 0x435   : > { %v390_v30 = vpop.xlane.xlu1 %389 }
 0x436   : > { %v383_v31 = vrot.slane %v382_v29, 2  ;;  %v391_v32 = vrot.slane %v390_v30, 4 }
 0x438   : > { %v392_v33 = vadd.f32 %v391_v32, %v390_v30  ;;  %v384_v34 = vadd.f32 %v383_v31, %v382_v29 }
 0x43a   : > { %v393_v35 = vrot.slane %v392_v33, 2  ;;  %v385_v36 = vrot.slane %v384_v34, 1 }
 0x43c   : > { %v394_v37 = vadd.f32 %v393_v35, %v392_v33  ;;  %v386_v38 = vadd.f32 %v385_v36, %v384_v34 }
 0x43e   : > { %520 = vpush %v386_v38  ;;  %v395_v39 = vrot.slane %v394_v37, 1 }
 0x440   : > { %v396_v40 = vadd.f32 %v395_v39, %v394_v37 }
 0x442   : > { %522 = vpush %v396_v40 }
 0x46f   : > { %s521_s28 = spop %520 }
 0x470   : > { %v403_v43 = vstv %s521_s28 }
 0x473   : > { %s523_s30 = spop %522 }
 0x474   : > { %v401_v42 = vstv %s523_s30 }
 0x475   : > { %v402_v44 = vsel %vm400_vm9, %v401_v42, 0.0 }
 0x476   : > { %v404_v45 = vsel %vm399_vm10, %v403_v43, %v402_v44 }
 0x477   : > { %v405_v46 = vadd.f32 %v404_v45, %v398_v41 }
 0x479   : > { %406 = vst [vmem:[%s759_s29] sm:$0x1] %v405_v46 }
 0x47a PF: > { %s513_s4 = sshll.u32 %s664_s15, 4  ;;  %s420_s8 = sshll.u32 %s759_s29, 4  ;;  %s421_s8 = int_to_ptr.vmem [resolvable:$true] %s420_s8 }
 0x47b   : > { %s418_s7 = scalar_lea.hbm %s858_s3, %s513_s4  ;;  %s408_s9 = scalar_lea.sflag [#allocation3], %s214_s26 }
 0x47c   : > { %s596_s10 = scalar_lea.vmem %s421_s8, 16  ;;  %s677_s11 = smov [#allocation2]  }
 0x47d   : > { %p597_p0 = scmp.ne.s32.totalorder %s421_s8, %s596_s10  ;;  %s600_s18 = sshll.u32 %s677_s11, 4  ;;  %s601_s18 = int_to_ptr.vmem [resolvable:$false] %s600_s18 }
 0x47e   : > { %s602_s19 = scalar_lea.vmem %s601_s18, 32  ;;  %p603_p3 = scmp.lt.s32.totalorder %s421_s8, %s601_s18 }
 0x47f   : > { %p598_p1 = pnand %p597_p0, %p738_p4  ;;  %p604_p5 = scmp.lt.s32.totalorder %s602_s19, %s596_s10 }
 0x481   : > { %p599_p2 = pneg %p598_p1  ;;  %p605_p6 = por %p604_p5, %p603_p3 }
 0x483   : > { %p606_p7 = pnand %p605_p6, %p599_p2 }
 0x485   : > { %609 = shalt.err (!%p606_p7)
}
 0x486   : > { %s610_s15 = scalar_lea.hbm %s418_s7, 16  ;;  %s614_s21 = scalar_lea.hbm %s858_s3, 32 }
 0x487   : > { %p611_p9 = scmp.ne.s32.totalorder %s418_s7, %s610_s15  ;;  %p615_p12 = scmp.lt.s32.totalorder %s418_s7, %s858_s3 }
 0x488   : > { %p616_p13 = scmp.lt.s32.totalorder %s614_s21, %s610_s15 }
 0x489   : > { %p612_p10 = pnand %p611_p9, %p738_p4 }
 0x48a   : > { %p617_p0 = por %p616_p13, %p615_p12 }
 0x48b   : > { %p613_p11 = pneg %p612_p10 }
 0x48d   : > { %p618_p1 = pnand %p617_p0, %p613_p11 }
 0x48f   : > { %621 = shalt.err (!%p618_p1)
}
 0x490   : > { %524 = dma.vmem_to_hbm [thread:$0]  (%p738_p4), %s421_s8, 16, %s418_s7, %s408_s9  }
 0x491 PF: > { %p530_p2 = scmp.ge.s32.totalorder %s672_s17, 2  ;;  %s432_s28 = sand.u32 1, %s652_s12  }
 0x492   : > { %s433_s30 = scalar_lea.sflag [#allocation3], %s432_s28 }
 0x493   : > { %p527_p3 = pnand %p530_p2, %p745_p8 }
 0x495   : > { %p528_p5 = pneg %p527_p3 }
 0x497   : > { %647 = dma.done.wait (%p528_p5), %s433_s30, 16  }
 0x498   : > { %649 = vsyncadd (%p528_p5), %s433_s30, 4294967280  ;;  %s16_s17 = sadd.s32 1, %s672_s17   ;;  %s861_s12 = smov %s656_s13 }
 0x499   : > { %p13_p6 = scmp.ge.s32.totalorder %s16_s17, 4   ;;  %s862_s13 = smov %s660_s14 }
 0x49a   : > { %s863_s14 = smov %s751_s25  ;;  %s864_s15 = smov %s668_s16 }
 0x49b   : > { %s865_s16 = smov %s867_s20  ;;  %15 = sbr.rel (!%p13_p6) target bundleno = 4 (0x4), region = 82 }
 0x4a0   :  { %437 = vsyncpa [#allocation3], 1 }
 0x4a1   :  { %439 = vsyncpa [#allocation3 + $0x1], 1 }

</bundles_post_ra>
